<compile_context>
chip_gen: v7x
topology: tpu7x:2x2x1
jax: 0.10.0
libtpu: 0.0.40
codegen_flags: <defaults>
</compile_context>

<pallas_src>
import jax
import jax.numpy as jnp
from jax.experimental import pallas as pl
from jax.experimental.pallas import tpu as pltpu


def attn_pool_kernel(x_ref, w_ref, b_ref, o_ref, m_sc, l_sc, acc_sc):
    # x_ref : (TB, TS, H) batch x seq-chunk block of activations (VMEM, native dtype)
    # w_ref : (1, H)      lane-dense Linear(H, 1) weight (VMEM, resident)
    # b_ref : (1,)        Linear bias, scalar path (SMEM, f32)
    # o_ref : (TB, H)     pooled outputs (dense sublane x lane tile), resident over S axis
    # m_sc/l_sc : (TB, 1) f32 running max / running denominator
    # acc_sc    : (TB, H) f32 running (un-normalized) weighted sum
    k = pl.program_id(1)

    @pl.when(k == 0)
    def _init():
        m_sc[...] = jnp.full(m_sc.shape, -jnp.inf, dtype=jnp.float32)
        l_sc[...] = jnp.zeros(l_sc.shape, dtype=jnp.float32)
        acc_sc[...] = jnp.zeros(acc_sc.shape, dtype=jnp.float32)

    x = x_ref[...]                                   # (TB, TS, H), native dtype
    w = w_ref[...]                                   # (1, H), native dtype
    bias = b_ref[0]                                  # f32 scalar (SMEM)

    # scores = x @ W^T + b via a lane reduce over H, landing directly in a
    # lane-dense (TB, TS) f32 view (no trailing size-1 dim for the softmax math).
    # TODO(synk): if bundle profiling shows the XLU slot saturating before HBM,
    # move this H-reduction onto the idle MXU (replicated-weight dot).
    scores = jnp.sum(x * w, axis=-1, dtype=jnp.float32) + bias       # (TB, TS)

    # Online (streaming) softmax over the sequence axis, chunk by chunk.
    m_prev = m_sc[...]                                               # (TB, 1)
    m_new = jnp.maximum(m_prev, jnp.max(scores, axis=-1, keepdims=True))
    alpha = jnp.exp(m_prev - m_new)                                  # (TB, 1)
    p = jnp.exp(scores - m_new)                                      # (TB, TS) f32
    l_sc[...] = alpha * l_sc[...] + jnp.sum(p, axis=-1, keepdims=True)

    # Weighted sum for this S chunk: probs cast down to x.dtype (no full-block
    # f32 upcast of x), S-accumulation requested in f32.
    pv = jnp.sum(p.astype(x.dtype)[:, :, None] * x, axis=1, dtype=jnp.float32)  # (TB, H)
    acc_sc[...] = alpha * acc_sc[...] + pv
    m_sc[...] = m_new

    @pl.when(k == pl.num_programs(1) - 1)
    def _finalize():
        inv = pl.reciprocal(l_sc[...], approx=False)   # exact: keeps f32 outputs at 1e-5 tol
        o_ref[...] = (acc_sc[...] * inv).astype(o_ref.dtype)


def _vmem_budget_bytes():
    """One unified, generation-aware VMEM budget used for tiling AND vmem_limit_bytes."""
    phys = 64 << 20  # conservative default = v7x per-TensorCore physical VMEM
    try:
        info = pltpu.get_tpu_info()
        phys = int(getattr(info, "vmem_capacity_bytes", phys))
    except Exception:
        pass
    # ~25% headroom for compiler scratch / spills; cap at 96 MiB (v5e/v6e), ~48 MiB on v7x.
    return min((phys * 3) // 4, 96 << 20)


def _pick_tiles(b_pad, s, h, x_itemsize, vmem_budget_bytes):
    """Pick (batch_tile, seq_tile) whose full working set fits the VMEM budget."""

    def usage(tb, ts):
        x_blocks = 2 * tb * ts * h * x_itemsize      # double-buffered input block
        prod_tmp = tb * ts * h * x_itemsize          # x*w / p*x product temporary
        stats = 4 * tb * ts * 4                      # scores / p / exp temps (f32)
        scratch = tb * h * 4 + 4 * tb * 4            # f32 acc + m/l accumulators
        out = 2 * tb * h * x_itemsize                # double-buffered output block
        wt = 2 * h * x_itemsize                      # resident weight
        return x_blocks + prod_tmp + stats + scratch + out + wt

    tb_cands = [256, 128, 64, 32, 16, 8]
    if b_pad >= 16:
        # keep >=2 batch steps so the "parallel" axis feeds both v7x TensorCores
        tb_cands = [c for c in tb_cands if c <= b_pad // 2] or [8]
    tb_cands = [c for c in tb_cands if b_pad % c == 0] or [8]

    # seq-chunk candidates: full S first, then multiple-of-8 divisors (descending)
    ts_cands = [s] + sorted({d for d in range(8, s, 8) if s % d == 0}, reverse=True)

    for tb in tb_cands:
        for ts in ts_cands:
            if usage(tb, ts) <= vmem_budget_bytes:
                return tb, ts
    # Nothing fits the budget: take the SMALLEST tiles tried (never a larger block).
    # TODO(synk): also chunk H (two-pass) for extreme S*H that still overflows.
    return tb_cands[-1], ts_cands[-1]


def attention_pooler(x, w, b, *, vmem_budget_bytes=None):
    """AttentionPooler forward.

    x: (B, S, H) activations.
    w: (1, H)    weight of nn.Linear(H, 1) (PyTorch layout, lane-dense).
    b: (1,)      bias of nn.Linear(H, 1).
    Returns (B, H) pooled output.
    """
    B, S, H = x.shape
    budget = int(vmem_budget_bytes) if vmem_budget_bytes is not None else _vmem_budget_bytes()

    # Pad batch to a multiple of 8 so tiles stay sublane-dense (padded rows are
    # all-zero -> finite scores -> safe softmax; they are sliced away below).
    b_pad = ((B + 7) // 8) * 8
    x_in = jnp.pad(x, ((0, b_pad - B), (0, 0), (0, 0))) if b_pad != B else x

    tb, ts = _pick_tiles(b_pad, S, H, jnp.dtype(x.dtype).itemsize, budget)
    grid = (b_pad // tb, S // ts)

    out = pl.pallas_call(
        attn_pool_kernel,
        out_shape=jax.ShapeDtypeStruct((b_pad, H), x.dtype),
        grid_spec=pltpu.PrefetchScalarGridSpec(
            num_scalar_prefetch=0,
            grid=grid,
            in_specs=[
                pl.BlockSpec((tb, ts, H), lambda i, k: (i, k, 0)),   # x block
                pl.BlockSpec((1, H), lambda i, k: (0, 0)),           # weight (resident)
                pl.BlockSpec(memory_space=pltpu.MemorySpace.SMEM),   # bias scalar
            ],
            out_specs=pl.BlockSpec((tb, H), lambda i, k: (i, 0)),    # resident over S axis
            scratch_shapes=[
                pltpu.VMEM((tb, 1), jnp.float32),   # running max
                pltpu.VMEM((tb, 1), jnp.float32),   # running denominator
                pltpu.VMEM((tb, H), jnp.float32),   # running weighted sum
            ],
        ),
        compiler_params=pltpu.CompilerParams(
            dimension_semantics=("parallel", "arbitrary"),
            vmem_limit_bytes=budget,                # same number used by _pick_tiles
        ),
    )(x_in, w, b.astype(jnp.float32))

    return out[:B] if b_pad != B else out


def reference(x, w, b):
    scores = jnp.einsum("bsh,oh->bso", x, w) + b     # (B, S, 1)
    att = jax.nn.softmax(scores, axis=1)             # softmax over seq
    return jnp.einsum("bso,bsh->bh", att, x)         # (B, H)


if __name__ == "__main__":
    B, S, H = 2, 8, 32
    key = jax.random.PRNGKey(0)
    kx, kw, kb = jax.random.split(key, 3)

    x = jax.random.normal(kx, (B, S, H), dtype=jnp.float32)
    # nn.Linear(H, 1): weight (1, H), bias (1,) — kept in PyTorch layout.
    w = jax.random.normal(kw, (1, H), dtype=jnp.float32) * 0.1
    b = jax.random.normal(kb, (1,), dtype=jnp.float32) * 0.1

    out = attention_pooler(x, w, b)
    out = jax.block_until_ready(out)

    ref = reference(x, w, b)
    assert out.shape == (B, H)
    assert jnp.allclose(out, ref, atol=1e-5, rtol=1e-5), "mismatch vs reference"
    print("KERNEL_OK")
</pallas_src>

<mosaic_0001>
module attributes {stable_mosaic.version = 11 : i64} {
  func.func @attn_pool_kernel(%arg0: i32, %arg1: i32, %arg2: memref<8x8x32xf32, #tpu.memory_space<vmem>>, %arg3: memref<1x32xf32, #tpu.memory_space<vmem>>, %arg4: memref<1xf32, #tpu.memory_space<smem>>, %arg5: memref<8x32xf32, #tpu.memory_space<vmem>>, %arg6: memref<8x1xf32, #tpu.memory_space<vmem>>, %arg7: memref<8x1xf32, #tpu.memory_space<vmem>>, %arg8: memref<8x32xf32, #tpu.memory_space<vmem>>) attributes {dimension_semantics = [#tpu.dimension_semantics<parallel>, #tpu.dimension_semantics<arbitrary>], iteration_bounds = array<i64: 1, 1>, scalar_prefetch = 0 : i64, scratch_operands = 3 : i64, tpu.core_type = #tpu.core_type<tc>, window_params = [{transform_indices = @transform_0, window_bounds = array<i64: 8, 8, 32>}, {pipeline_mode = #tpu.pipeline_mode<synchronous>, transform_indices = @transform_1, window_bounds = array<i64: 1, 32>}, {transform_indices = @transform_2, window_bounds = array<i64: 1>}, {transform_indices = @transform_3, window_bounds = array<i64: 8, 32>}]} {
    %c0_i32 = arith.constant 0 : i32
    %0 = arith.cmpi eq, %arg1, %c0_i32 : i32
    %1 = arith.extui %0 : i1 to i32
    %c0_i32_0 = arith.constant 0 : i32
    %2 = arith.cmpi ne, %1, %c0_i32_0 : i32
    scf.if %2 {
      %cst_23 = arith.constant 0xFF800000 : f32
      %40 = vector.broadcast %cst_23 : f32 to vector<8x1xf32>
      %c0_24 = arith.constant 0 : index
      %c0_25 = arith.constant 0 : index
      %41 = vector.load %arg6[%c0_24, %c0_25] : memref<8x1xf32, #tpu.memory_space<vmem>>, vector<8x1xf32>
      tpu.vector_store %arg6[%c0_24, %c0_25], %40 {strides = array<i32>} : memref<8x1xf32, #tpu.memory_space<vmem>>, vector<8x1xf32>,
      %cst_26 = arith.constant 0.000000e+00 : f32
      %42 = vector.broadcast %cst_26 : f32 to vector<8x1xf32>
      %c0_27 = arith.constant 0 : index
      %c0_28 = arith.constant 0 : index
      %43 = vector.load %arg7[%c0_27, %c0_28] : memref<8x1xf32, #tpu.memory_space<vmem>>, vector<8x1xf32>
      tpu.vector_store %arg7[%c0_27, %c0_28], %42 {strides = array<i32>} : memref<8x1xf32, #tpu.memory_space<vmem>>, vector<8x1xf32>,
      %cst_29 = arith.constant 0.000000e+00 : f32
      %44 = vector.broadcast %cst_29 : f32 to vector<8x32xf32>
      %c0_30 = arith.constant 0 : index
      %c0_31 = arith.constant 0 : index
      %45 = vector.load %arg8[%c0_30, %c0_31] : memref<8x32xf32, #tpu.memory_space<vmem>>, vector<8x32xf32>
      tpu.vector_store %arg8[%c0_30, %c0_31], %44 {strides = array<i32>} : memref<8x32xf32, #tpu.memory_space<vmem>>, vector<8x32xf32>,
    } else {
    }
    %c0 = arith.constant 0 : index
    %c0_1 = arith.constant 0 : index
    %c0_2 = arith.constant 0 : index
    %3 = vector.load %arg2[%c0, %c0_1, %c0_2] : memref<8x8x32xf32, #tpu.memory_space<vmem>>, vector<8x8x32xf32>
    %c0_3 = arith.constant 0 : index
    %c0_4 = arith.constant 0 : index
    %4 = vector.load %arg3[%c0_3, %c0_4] : memref<1x32xf32, #tpu.memory_space<vmem>>, vector<1x32xf32>
    %c0_5 = arith.constant 0 : index
    %5 = memref.load %arg4[%c0_5] : memref<1xf32, #tpu.memory_space<smem>>
    %6 = vector.shape_cast %4 : vector<1x32xf32> to vector<1x1x32xf32>
    %7 = vector.broadcast %6 : vector<1x1x32xf32> to vector<8x8x32xf32>
    %8 = arith.mulf %3, %7 : vector<8x8x32xf32>
    %cst = arith.constant dense<0.000000e+00> : vector<8x8xf32>
    %9 = vector.multi_reduction <add>, %8, %cst [2] : vector<8x8x32xf32> to vector<8x8xf32>
    %10 = vector.broadcast %5 : f32 to vector<8x8xf32>
    %11 = arith.addf %9, %10 : vector<8x8xf32>
    %c0_6 = arith.constant 0 : index
    %c0_7 = arith.constant 0 : index
    %12 = vector.load %arg6[%c0_6, %c0_7] : memref<8x1xf32, #tpu.memory_space<vmem>>, vector<8x1xf32>
    %cst_8 = arith.constant dense<0xFF800000> : vector<8xf32>
    %13 = vector.multi_reduction <maximumf>, %11, %cst_8 [1] : vector<8x8xf32> to vector<8xf32>
    %14 = vector.shape_cast %13 : vector<8xf32> to vector<8x1xf32>
    %15 = arith.maximumf %12, %14 : vector<8x1xf32>
    %16 = arith.subf %12, %15 : vector<8x1xf32>
    %17 = math.exp %16 : vector<8x1xf32>
    %18 = vector.broadcast %15 : vector<8x1xf32> to vector<8x8xf32>
    %19 = arith.subf %11, %18 : vector<8x8xf32>
    %20 = math.exp %19 : vector<8x8xf32>
    %c0_9 = arith.constant 0 : index
    %c0_10 = arith.constant 0 : index
    %21 = vector.load %arg7[%c0_9, %c0_10] : memref<8x1xf32, #tpu.memory_space<vmem>>, vector<8x1xf32>
    %22 = arith.mulf %17, %21 : vector<8x1xf32>
    %cst_11 = arith.constant dense<0.000000e+00> : vector<8xf32>
    %23 = vector.multi_reduction <add>, %20, %cst_11 [1] : vector<8x8xf32> to vector<8xf32>
    %24 = vector.shape_cast %23 : vector<8xf32> to vector<8x1xf32>
    %25 = arith.addf %22, %24 : vector<8x1xf32>
    %c0_12 = arith.constant 0 : index
    %c0_13 = arith.constant 0 : index
    %26 = vector.load %arg7[%c0_12, %c0_13] : memref<8x1xf32, #tpu.memory_space<vmem>>, vector<8x1xf32>
    tpu.vector_store %arg7[%c0_12, %c0_13], %25 {strides = array<i32>} : memref<8x1xf32, #tpu.memory_space<vmem>>, vector<8x1xf32>,
    %27 = vector.shape_cast %20 : vector<8x8xf32> to vector<8x8x1xf32>
    %28 = vector.broadcast %27 : vector<8x8x1xf32> to vector<8x8x32xf32>
    %29 = arith.mulf %28, %3 : vector<8x8x32xf32>
    %cst_14 = arith.constant dense<0.000000e+00> : vector<8x32xf32>
    %30 = vector.multi_reduction <add>, %29, %cst_14 [1] : vector<8x8x32xf32> to vector<8x32xf32>
    %c0_15 = arith.constant 0 : index
    %c0_16 = arith.constant 0 : index
    %31 = vector.load %arg8[%c0_15, %c0_16] : memref<8x32xf32, #tpu.memory_space<vmem>>, vector<8x32xf32>
    %32 = vector.broadcast %17 : vector<8x1xf32> to vector<8x32xf32>
    %33 = arith.mulf %32, %31 : vector<8x32xf32>
    %34 = arith.addf %33, %30 : vector<8x32xf32>
    %c0_17 = arith.constant 0 : index
    %c0_18 = arith.constant 0 : index
    %35 = vector.load %arg8[%c0_17, %c0_18] : memref<8x32xf32, #tpu.memory_space<vmem>>, vector<8x32xf32>
    tpu.vector_store %arg8[%c0_17, %c0_18], %34 {strides = array<i32>} : memref<8x32xf32, #tpu.memory_space<vmem>>, vector<8x32xf32>,
    %c0_19 = arith.constant 0 : index
    %c0_20 = arith.constant 0 : index
    %36 = vector.load %arg6[%c0_19, %c0_20] : memref<8x1xf32, #tpu.memory_space<vmem>>, vector<8x1xf32>
    tpu.vector_store %arg6[%c0_19, %c0_20], %15 {strides = array<i32>} : memref<8x1xf32, #tpu.memory_space<vmem>>, vector<8x1xf32>,
    %c0_i32_21 = arith.constant 0 : i32
    %37 = arith.cmpi eq, %arg1, %c0_i32_21 : i32
    %38 = arith.extui %37 : i1 to i32
    %c0_i32_22 = arith.constant 0 : i32
    %39 = arith.cmpi ne, %38, %c0_i32_22 : i32
    scf.if %39 {
      %c0_23 = arith.constant 0 : index
      %c0_24 = arith.constant 0 : index
      %40 = vector.load %arg7[%c0_23, %c0_24] : memref<8x1xf32, #tpu.memory_space<vmem>>, vector<8x1xf32>
      %41 = tpu.reciprocal %40 : vector<8x1xf32> -> vector<8x1xf32>
      %c0_25 = arith.constant 0 : index
      %c0_26 = arith.constant 0 : index
      %42 = vector.load %arg8[%c0_25, %c0_26] : memref<8x32xf32, #tpu.memory_space<vmem>>, vector<8x32xf32>
      %43 = vector.broadcast %41 : vector<8x1xf32> to vector<8x32xf32>
      %44 = arith.mulf %42, %43 : vector<8x32xf32>
      %c0_27 = arith.constant 0 : index
      %c0_28 = arith.constant 0 : index
      %45 = vector.load %arg5[%c0_27, %c0_28] : memref<8x32xf32, #tpu.memory_space<vmem>>, vector<8x32xf32>
      tpu.vector_store %arg5[%c0_27, %c0_28], %44 {strides = array<i32>} : memref<8x32xf32, #tpu.memory_space<vmem>>, vector<8x32xf32>,
    } else {
    }
    return
  }
  func.func @transform_0(%arg0: i32, %arg1: i32) -> (i32, i32, i32) {
    %c0_i32 = arith.constant 0 : i32
    %c0_i32_0 = arith.constant 0 : i32
    return %arg0, %arg1, %c0_i32 : i32, i32, i32
  }
  func.func @transform_1(%arg0: i32, %arg1: i32) -> (i32, i32) {
    %c0_i32 = arith.constant 0 : i32
    %c0_i32_0 = arith.constant 0 : i32
    %c0_i32_1 = arith.constant 0 : i32
    return %c0_i32, %c0_i32_0 : i32, i32
  }
  func.func @transform_2(%arg0: i32, %arg1: i32) -> i32 {
    %c0_i32 = arith.constant 0 : i32
    %c0_i32_0 = arith.constant 0 : i32
    return %c0_i32 : i32
  }
  func.func @transform_3(%arg0: i32, %arg1: i32) -> (i32, i32) {
    %c0_i32 = arith.constant 0 : i32
    %c0_i32_0 = arith.constant 0 : i32
    return %arg0, %c0_i32 : i32, i32
  }
}

</mosaic_0001>

<bundles_post_ra>
// kernel: tpu_custom_call.1
= control target key start
LH: loop header
LB: loop body
LE: loop exit
PB: predicated region body
PF: predicated region fallthrough
CT: control target
= control target key end

     0   :  { %9 = vsyncpa [#allocation7], 0  ;;  %s711_s0 = inlined_call_operand.hbm [shape: f32[8,8,32], index: 0, kind: input, shape index: {}]   ;;  %s712_s1 = inlined_call_operand.vmem [shape: f32[1,32], index: 1, kind: input, shape index: {}]   ;;  %s713_s2 = inlined_call_operand.<no memory space> [shape: f32[1], index: 2, kind: input, shape index: {}]   ;;  %s714_s3 = inlined_call_operand.hbm [shape: f32[8,32], index: 3, kind: output, shape index: {}]  }
   0x1   :  { %10 = vsyncpa [#allocation8], 0  ;;  %s515_s12 = smov [#allocation6]   ;;  %s467_s16 = scalar_lea.hbm %s711_s0, 1024 }
   0x2   :  { %s16_s13 = sshll.u32 %s515_s12, 4  ;;  %p468_p0 = scmp.ne.s32.totalorder %s711_s0, %s467_s16  ;;  %s17_s13 = int_to_ptr.vmem [resolvable:$true] %s16_s13 }
   0x3   :  { %p471_p1 = scmp.lt.u32.totalorder %s467_s16, %s711_s0 }
   0x5   :  { %p473_p2 = pnand %p471_p1, %p468_p0 }
   0x7   :  { %476 = shalt.err (!%p473_p2)
}
   0x8   :  { %s477_s21 = scalar_lea.vmem %s17_s13, 1024  ;;  %p482_p4 = scmp.lt.s32.totalorder %s17_s13, %s17_s13 }
   0x9   :  { %p478_p3 = scmp.ne.s32.totalorder %s17_s13, %s477_s21  ;;  %p483_p5 = scmp.lt.s32.totalorder %s477_s21, %s477_s21 }
   0xb   :  { %p484_p6 = por %p483_p5, %p482_p4 }
   0xd   :  { %p485_p7 = pnand %p484_p6, %p478_p3 }
   0xf   :  { %488 = shalt.err (!%p485_p7)
}
  0x10   :  { %s516_s22 = smov 128   ;;  %s517_s23 = smov 8  }
  0x11   :  { %22 = dma.hbm_to_vmem [thread:$0]  %s711_s0, 1024, %s17_s13, [#allocation7], %s516_s22, %s516_s22, %s517_s23  }
  0x12   :  { %511 = dma.done.wait [#allocation7], 1024  }
  0x13   :  { %512 = vsyncadd [#allocation7], 4294966272  ;;  %vm37_vm0 = vcmask 261120   ;;  %v554_v0 = vld [vmem:[#allocation6] sm:$0xff]  ;;  %v437_v1 = vld [vmem:[%s712_s1] ss:$0 sm:$0xff]  ;;  %v106_v26 = vlaneseq  ;;  %v88_v29 = vstv %s713_s2 }
  0x14   :  { %v559_v2 = vld [vmem:[#allocation6 + $0x10] sm:$0xff]  ;;  %v55_v3 = vmul.f32 %v437_v1, %v554_v0  ;;  %v563_v5 = vld [vmem:[#allocation6 + $0x8] sm:$0xff]  ;;  %v565_v6 = vld [vmem:[#allocation6 + $0x18] sm:$0xff]  ;;  %vm34_vm1 = vcmask 7168   ;;  %v518_v25 = vmov -inf   ;;  %vm140_vm2 = vcmask 1041409  }
  0x15   :  { %v57_v4 = vmul.f32 %v437_v1, %v559_v2  ;;  %v56_v7 = vmul.f32 %v437_v1, %v563_v5  ;;  %v58_v8 = vmul.f32 %v437_v1, %v565_v6  ;;  %v569_v9 = vld [vmem:[#allocation6 + $0x20] sm:$0xff]  ;;  %v571_v10 = vld [vmem:[#allocation6 + $0x28] sm:$0xff]  ;;  %v579_v17 = vld [vmem:[#allocation6 + $0x30] sm:$0xff]  ;;  %35 = vst.msk [vmem:[#allocation2] sm:$0xff] %vm34_vm1, %v518_v25  ;;  %v107_v27 = vand.u32 127, %v106_v26  ;;  %s521_s2 = smov [#allocation9]  }
  0x16   :  { %v64_v11 = vsel %vm37_vm0, %v55_v3, 0.0  ;;  %v59_v15 = vmul.f32 %v437_v1, %v569_v9  ;;  %v60_v16 = vmul.f32 %v437_v1, %v571_v10  ;;  %v581_v18 = vld [vmem:[#allocation6 + $0x38] sm:$0xff]  ;;  %v61_v21 = vmul.f32 %v437_v1, %v579_v17  ;;  %s428_s28 = sshll.u32 %s521_s2, 4  ;;  %s429_s28 = int_to_ptr.vmem [resolvable:$true] %s428_s28 }
  0x17   :  { %v70_v12 = vsel %vm37_vm0, %v57_v4, 0.0  ;;  %65 = vadd.xlane.f32.xlu0 %v64_v11  ;;  %v67_v13 = vsel %vm37_vm0, %v56_v7, 0.0  ;;  %v73_v14 = vsel %vm37_vm0, %v58_v8, 0.0  ;;  %v62_v22 = vmul.f32 %v437_v1, %v581_v18  ;;  %s489_s29 = scalar_lea.vmem %s429_s28, 128  ;;  %p494_p9 = scmp.lt.s32.totalorder %s429_s28, %s429_s28 }
  0x18   :  { %71 = vadd.xlane.f32.xlu1 %v70_v12  ;;  %v76_v19 = vsel %vm37_vm0, %v59_v15, 0.0  ;;  %v79_v20 = vsel %vm37_vm0, %v60_v16, 0.0  ;;  %v82_v23 = vsel %vm37_vm0, %v61_v21, 0.0  ;;  %v590_v28 = vshrl.u32 %v106_v26, 7  ;;  %p490_p8 = scmp.ne.s32.totalorder %s429_s28, %s489_s29  ;;  %p495_p10 = scmp.lt.s32.totalorder %s489_s29, %s489_s29 }
  0x19   :  { %v85_v24 = vsel %vm37_vm0, %v62_v22, 0.0  ;;  %vm142_vm3 = vcmask 1042434   ;;  %vm144_vm4 = vcmask 1043459   ;;  %vm146_vm5 = vcmask 1044484  }
  0x1a   :  { %v596_v32 = vsub.s32 %v107_v27, %v590_v28  ;;  %vm148_vm6 = vcmask 1045509   ;;  %vm150_vm7 = vcmask 1046534   ;;  %vm152_vm8 = vcmask 1047559   ;;  %p496_p11 = por %p495_p10, %p494_p9 }
  0x1b   :  { %68 = vadd.xlane.f32.xlu0 %v67_v13  ;;  %vm155_vm9 = vcmask 64512   ;;  %v519_v63 = vmov 0   ;;  %v520_v1 = vmov 0.0   ;;  %v169_v11 = vsub.s32 0, %v590_v28 }
  0x1c   :  { %74 = vadd.xlane.f32.xlu1 %v73_v14  ;;  %446 = vset.pattern.permute.xlu0 %v519_v63  ;;  %38 = vst.msk [vmem:[#allocation4] sm:$0xff] %vm37_vm0, %v520_v1  ;;  %v97_v3 = vld [vmem:[#allocation2] sm:$0xff]  ;;  %v173_v12 = vsub.s32 1, %v590_v28  ;;  %v177_v13 = vsub.s32 2, %v590_v28  ;;  %v181_v14 = vsub.s32 3, %v590_v28  ;;  %p497_p12 = pnand %p496_p11, %p490_p8 }
  0x1d   :  { %445 = vset.pattern.permute.xlu1 %v519_v63  ;;  %36 = vst.msk [vmem:[#allocation3] sm:$0xff] %vm34_vm1, %v520_v1 }
  0x1f   :  { %77 = vadd.xlane.f32.xlu0 %v76_v19 }
  0x20   :  { %80 = vadd.xlane.f32.xlu1 %v79_v20 }
  0x23   :  { %83 = vadd.xlane.f32.xlu0 %v82_v23  ;;  %v185_v23 = vsub.s32 4, %v590_v28 }
  0x24   :  { %86 = vadd.xlane.f32.xlu1 %v85_v24 }
  0xa4   :  { %v66_v30 = vpop.xlane.xlu0 %65 }
  0xa5   :  { %v72_v31 = vpop.xlane.xlu1 %71  ;;  %v598_v33 = vadd.f32 %v88_v29, %v66_v30  ;;  %v189_v30 = vsub.s32 5, %v590_v28 }
  0xa6   :  { %v600_v34 = vadd.f32 %v88_v29, %v72_v31 }
  0xa7   :  { %v111_v39 = vrot.slane %v598_v33, %v596_v32 }
  0xa8   :  { %v69_v35 = vpop.xlane.xlu0 %68  ;;  %v119_v42 = vrot.slane %v600_v34, %v596_v32 }
  0xa9   :  { %v75_v36 = vpop.xlane.xlu1 %74  ;;  %v90_v37 = vadd.f32 %v88_v29, %v69_v35 }
  0xaa   :  { %v602_v38 = vadd.f32 %v88_v29, %v75_v36 }
  0xab   :  { %v115_v40 = vrot.slane %v90_v37, %v596_v32 }
  0xac   :  { %v123_v41 = vrot.slane %v602_v38, %v596_v32  ;;  %v78_v43 = vpop.xlane.xlu0 %77 }
  0xad   :  { %v81_v44 = vpop.xlane.xlu1 %80  ;;  %v141_v45 = vsel %vm140_vm2, %v115_v40, %v111_v39  ;;  %v612_v46 = vadd.f32 %v88_v29, %v78_v43 }
  0xae   :  { %v614_v47 = vadd.f32 %v88_v29, %v81_v44  ;;  %v143_v48 = vsel %vm142_vm3, %v119_v42, %v141_v45 }
  0xaf   :  { %v145_v49 = vsel %vm144_vm4, %v123_v41, %v143_v48  ;;  %v127_v50 = vrot.slane %v612_v46, %v596_v32 }
  0xb0   :  { %v131_v51 = vrot.slane %v614_v47, %v596_v32  ;;  %v84_v52 = vpop.xlane.xlu0 %83 }
  0xb1   :  { %v87_v53 = vpop.xlane.xlu1 %86  ;;  %v147_v54 = vsel %vm146_vm5, %v127_v50, %v145_v49  ;;  %v623_v55 = vadd.f32 %v88_v29, %v84_v52 }
  0xb2   :  { %v625_v56 = vadd.f32 %v88_v29, %v87_v53  ;;  %v149_v59 = vsel %vm148_vm6, %v131_v51, %v147_v54 }
  0xb3   :  { %v135_v57 = vrot.slane %v623_v55, %v596_v32 }
  0xb4   :  { %v139_v58 = vrot.slane %v625_v56, %v596_v32 }
  0xb5   :  { %v151_v60 = vsel %vm150_vm7, %v135_v57, %v149_v59 }
  0xb6   :  { %v153_v61 = vsel %vm152_vm8, %v139_v58, %v151_v60 }
  0xb7   :  { %v156_v62 = vsel %vm155_vm9, %v153_v61, -inf }
  0xb8   :  { %157 = vmax.xlane.f32.xlu0 %v156_v62 }
 0x145   :  { %v158_v4 = vpop.xlane.xlu0 %157 }
 0x146   :  { %v159_v7 = vmax.f32 %v97_v3, %v158_v4 }
 0x148   :  { %v160_v8 = vsub.f32 %v97_v3, %v159_v7  ;;  %408 = vst.msk [vmem:[#allocation2] sm:$0xff] %vm34_vm1, %v159_v7  ;;  %165 = vperm.xlu1 %445, %v159_v7  }
 0x14a   :  { %v161_v29 = vmul.f32 1.442695, %v160_v8 }
 0x1c7   :  { %v166_v15 = vpop.permute.xlu1 %165 }
 0x1c8   :  { %v170_v16 = vrot.slane %v166_v15, %v169_v11  ;;  %v174_v19 = vrot.slane %v166_v15, %v173_v12  ;;  %v178_v20 = vrot.slane %v166_v15, %v177_v13  ;;  %v182_v24 = vrot.slane %v166_v15, %v181_v14 }
 0x1c9   :  { %v186_v31 = vrot.slane %v166_v15, %v185_v23 }
 0x1ca   :  { %v207_v21 = vsub.f32 %v598_v33, %v170_v16  ;;  %v208_v22 = vsub.f32 %v90_v37, %v174_v19  ;;  %v209_v25 = vsub.f32 %v600_v34, %v178_v20  ;;  %v210_v35 = vsub.f32 %v602_v38, %v182_v24 }
 0x1cb   :  { %v193_v33 = vsub.s32 6, %v590_v28  ;;  %v190_v37 = vrot.slane %v166_v15, %v189_v30  ;;  %v211_v39 = vsub.f32 %v612_v46, %v186_v31  ;;  %v197_v34 = vsub.s32 7, %v590_v28 }
 0x1cc   :  { %v215_v26 = vmul.f32 1.442695, %v207_v21  ;;  %v217_v27 = vmul.f32 1.442695, %v208_v22  ;;  %v219_v36 = vmul.f32 1.442695, %v209_v25 }
 0x1cd   :  { %v221_v40 = vmul.f32 1.442695, %v210_v35  ;;  %v194_v41 = vrot.slane %v166_v15, %v193_v33  ;;  %v212_v42 = vsub.f32 %v614_v47, %v190_v37  ;;  %v223_v43 = vmul.f32 1.442695, %v211_v39 }
 0x1ce   :  { %447 = vpow2.f32 %v215_v26  ;;  %v198_v38 = vrot.slane %v166_v15, %v197_v34 }
 0x1cf   :  { %449 = vpow2.f32 %v217_v27  ;;  %v213_v48 = vsub.f32 %v623_v55, %v194_v41  ;;  %v225_v49 = vmul.f32 1.442695, %v212_v42 }
 0x1d0   :  { %451 = vpow2.f32 %v161_v29  ;;  %v214_v28 = vsub.f32 %v625_v56, %v198_v38 }
 0x1d1   :  { %453 = vpow2.f32 %v219_v36  ;;  %v227_v47 = vmul.f32 1.442695, %v213_v48 }
 0x1d2   :  { %455 = vpow2.f32 %v221_v40  ;;  %v229_v52 = vmul.f32 1.442695, %v214_v28 }
 0x1d3   :  { %457 = vpow2.f32 %v223_v43 }
 0x1d4   :  { %459 = vpow2.f32 %v225_v49 }
 0x1d5   :  { %461 = vpow2.f32 %v227_v47 }
 0x1d6   :  { %463 = vpow2.f32 %v229_v52 }
 0x1d8   :  { %v448_v44 = vpop.eup %447 }
 0x1d9   :  { %v450_v45 = vpop.eup %449  ;;  %242 = vperm.xlu0 %446, %v448_v44  }
 0x1da   :  { %245 = vperm.xlu1 %445, %v450_v45   ;;  %v652_v50 = vpop.eup %451 }
 0x1db   :  { %v454_v46 = vpop.eup %453 }
 0x1dc   :  { %v456_v51 = vpop.eup %455 }
 0x1dd   :  { %386 = vperm.xlu0 %446, %v652_v50   ;;  %v458_v53 = vpop.eup %457 }
 0x1de   :  { %248 = vperm.xlu1 %445, %v454_v46   ;;  %v460_v54 = vpop.eup %459 }
 0x1df   :  { %v462_v55 = vpop.eup %461 }
 0x1e0   :  { %v464_v57 = vpop.eup %463 }
 0x1e2   :  { %251 = vperm.xlu1 %445, %v456_v51  }
 0x1e6   :  { %254 = vperm.xlu1 %445, %v458_v53  }
 0x1ea   :  { %257 = vperm.xlu1 %445, %v460_v54  }
 0x1ee   :  { %260 = vperm.xlu1 %445, %v462_v55  }
 0x1f2   :  { %263 = vperm.xlu1 %445, %v464_v57  }
 0x258   :  { %v243_v58 = vpop.permute.xlu0 %242 }
 0x259   :  { %v246_v59 = vpop.permute.xlu1 %245  ;;  %v319_v60 = vmul.f32 %v243_v58, %v554_v0 }
 0x25a   :  { %v320_v56 = vmul.f32 %v246_v59, %v563_v5  ;;  %v272_v24 = vrot.slane %v246_v59, %v596_v32 }
 0x25b   :  { %v327_v61 = vsel %vm37_vm0, %v319_v60, 0.0 }
 0x25c   :  { %v334_v1 = vsel %vm37_vm0, %v320_v56, 0.0  ;;  %v328_v3 = vrot.slane %v327_v61, 4 }
 0x25d   :  { %v249_v62 = vpop.permute.xlu1 %248  ;;  %v335_v11 = vrot.slane %v334_v1, 4 }
 0x25e   :  { %v321_v63 = vmul.f32 %v249_v62, %v559_v2  ;;  %v329_v12 = vadd.f32 %v328_v3, %v327_v61  ;;  %v276_v27 = vrot.slane %v249_v62, %v596_v32 }
 0x25f   :  { %v336_v16 = vadd.f32 %v335_v11, %v334_v1 }
 0x260   :  { %v341_v4 = vsel %vm37_vm0, %v321_v63, 0.0  ;;  %v330_v19 = vrot.slane %v329_v12, 2 }
 0x261   :  { %v252_v7 = vpop.permute.xlu1 %251  ;;  %v342_v13 = vrot.slane %v341_v4, 4  ;;  %v337_v26 = vrot.slane %v336_v16, 2 }
 0x262   :  { %v322_v8 = vmul.f32 %v252_v7, %v565_v6  ;;  %v268_v6 = vrot.slane %v243_v58, %v596_v32  ;;  %v331_v30 = vadd.f32 %v330_v19, %v329_v12  ;;  %v280_v31 = vrot.slane %v252_v7, %v596_v32 }
 0x263   :  { %v343_v2 = vadd.f32 %v342_v13, %v341_v4  ;;  %v338_v42 = vadd.f32 %v337_v26, %v336_v16 }
 0x264   :  { %v348_v0 = vsel %vm37_vm0, %v322_v8, 0.0  ;;  %v297_v40 = vsel %vm140_vm2, %v272_v24, %v268_v6  ;;  %v332_v38 = vrot.slane %v331_v30, 1  ;;  %v387_v24 = vpop.permute.xlu0 %386 }
 0x265   :  { %v349_v14 = vrot.slane %v348_v0, 4  ;;  %v255_v5 = vpop.permute.xlu1 %254  ;;  %v298_v43 = vsel %vm142_vm3, %v276_v27, %v297_v40  ;;  %v339_v58 = vrot.slane %v338_v42, 1 }
 0x266   :  { %v323_v15 = vmul.f32 %v255_v5, %v569_v9  ;;  %v344_v9 = vrot.slane %v343_v2, 2  ;;  %v284_v33 = vrot.slane %v255_v5, %v596_v32  ;;  %v299_v49 = vsel %vm144_vm4, %v280_v31, %v298_v43 }
 0x267   :  { %v350_v21 = vadd.f32 %v349_v14, %v348_v0  ;;  %v333_v7 = vadd.f32 %v332_v38, %v331_v30 }
 0x268   :  { %v355_v20 = vsel %vm37_vm0, %v323_v15, 0.0  ;;  %v345_v48 = vadd.f32 %v344_v9, %v343_v2  ;;  %v300_v47 = vsel %vm146_vm5, %v284_v33, %v299_v49 }
 0x269   :  { %v356_v22 = vrot.slane %v355_v20, 4  ;;  %v258_v23 = vpop.permute.xlu1 %257  ;;  %v351_v36 = vrot.slane %v350_v21, 2 }
 0x26a   :  { %v324_v25 = vmul.f32 %v258_v23, %v571_v10  ;;  %v288_v10 = vrot.slane %v258_v23, %v596_v32  ;;  %v346_v61 = vrot.slane %v345_v48, 1  ;;  %v383_v23 = vld [vmem:[#allocation4] sm:$0xff] }
 0x26b   :  { %v357_v29 = vadd.f32 %v356_v22, %v355_v20  ;;  %v352_v28 = vadd.f32 %v351_v36, %v350_v21  ;;  %v389_v30 = vmul.f32 %v387_v24, %v383_v23  ;;  %v231_v36 = vld [vmem:[#allocation3] sm:$0xff] }
 0x26c   :  { %v362_v35 = vsel %vm37_vm0, %v324_v25, 0.0  ;;  %v301_v57 = vsel %vm148_vm6, %v288_v10, %v300_v47  ;;  %v347_v0 = vadd.f32 %v346_v61, %v345_v48  ;;  %v232_v33 = vmul.f32 %v652_v50, %v231_v36 }
 0x26d   :  { %v363_v37 = vrot.slane %v362_v35, 4  ;;  %v261_v39 = vpop.permute.xlu1 %260  ;;  %v358_v34 = vrot.slane %v357_v29, 2  ;;  %v353_v1 = vrot.slane %v352_v28, 1 }
 0x26e   :  { %v325_v41 = vmul.f32 %v261_v39, %v579_v17  ;;  %v292_v45 = vrot.slane %v261_v39, %v596_v32 }
 0x26f   :  { %v364_v44 = vadd.f32 %v363_v37, %v362_v35  ;;  %v359_v54 = vadd.f32 %v358_v34, %v357_v29  ;;  %v354_v14 = vadd.f32 %v353_v1, %v352_v28 }
 0x270   :  { %v369_v46 = vsel %vm37_vm0, %v325_v41, 0.0  ;;  %v302_v56 = vsel %vm150_vm7, %v292_v45, %v301_v57 }
 0x271   :  { %v365_v51 = vrot.slane %v364_v44, 2  ;;  %v370_v52 = vrot.slane %v369_v46, 4  ;;  %v264_v53 = vpop.permute.xlu1 %263  ;;  %v360_v8 = vrot.slane %v359_v54, 1 }
 0x272   :  { %v296_v17 = vrot.slane %v264_v53, %v596_v32  ;;  %v326_v55 = vmul.f32 %v264_v53, %v581_v18  ;;  %v340_v18 = vadd.f32 %v339_v58, %v338_v42 }
 0x273   :  { %v366_v59 = vadd.f32 %v365_v51, %v364_v44  ;;  %v371_v60 = vadd.f32 %v370_v52, %v369_v46  ;;  %v361_v16 = vadd.f32 %v360_v8, %v359_v54 }
 0x274   :  { %v376_v62 = vsel %vm37_vm0, %v326_v55, 0.0  ;;  %v303_v63 = vsel %vm152_vm8, %v296_v17, %v302_v56  ;;  %v398_v19 = vsel %vm140_vm2, %v340_v18, %v333_v7 }
 0x275   :  { %v372_v3 = vrot.slane %v371_v60, 2  ;;  %v377_v4 = vrot.slane %v376_v62, 4  ;;  %v305_v32 = vsel %vm155_vm9, %v303_v63, 0.0  ;;  %v367_v11 = vrot.slane %v366_v59, 1 }
 0x276   :  { %306 = vadd.xlane.f32.xlu1 %v305_v32  ;;  %v399_v21 = vsel %vm142_vm3, %v347_v0, %v398_v19 }
 0x277   :  { %v373_v12 = vadd.f32 %v372_v3, %v371_v60  ;;  %v378_v13 = vadd.f32 %v377_v4, %v376_v62  ;;  %v368_v2 = vadd.f32 %v367_v11, %v366_v59  ;;  %v400_v6 = vsel %vm144_vm4, %v354_v14, %v399_v21 }
 0x278   :  { %v401_v26 = vsel %vm146_vm5, %v361_v16, %v400_v6 }
 0x279   :  { %v374_v5 = vrot.slane %v373_v12, 1  ;;  %v379_v15 = vrot.slane %v378_v13, 2  ;;  %v402_v27 = vsel %vm148_vm6, %v368_v2, %v401_v26 }
 0x27b   :  { %v380_v20 = vadd.f32 %v379_v15, %v378_v13  ;;  %v375_v22 = vadd.f32 %v374_v5, %v373_v12 }
 0x27d   :  { %v381_v25 = vrot.slane %v380_v20, 1  ;;  %v403_v9 = vsel %vm150_vm7, %v375_v22, %v402_v27 }
 0x27f   :  { %v382_v29 = vadd.f32 %v381_v25, %v380_v20 }
 0x281   :  { %v404_v31 = vsel %vm152_vm8, %v382_v29, %v403_v9 }
 0x282   :  { %v406_v35 = vadd.f32 %v404_v31, %v389_v30 }
 0x284   :  { %407 = vst.msk [vmem:[#allocation4] sm:$0xff] %vm37_vm0, %v406_v35 }
 0x28b   :  { %v414_v10 = vld [vmem:[#allocation4] sm:$0xff] }
 0x303   :  { %v307_v37 = vpop.xlane.xlu1 %306 }
 0x304   :  { %v308_v39 = vadd.f32 %v307_v37, %v232_v33 }
 0x306   :  { %310 = vst.msk [vmem:[#allocation3] sm:$0xff] %vm34_vm1, %v308_v39 }
 0x30d   :  { %v412_v40 = vld [vmem:[#allocation3] sm:$0xff] }
 0x30e   :  { %465 = vrcp.f32 %v412_v40 }
 0x318   :  { %v466_v34 = vpop.eup %465 }
 0x319   :  { %417 = vperm.xlu0 %446, %v466_v34  }
 0x398   :  { %v418_v41 = vpop.permute.xlu0 %417 }
 0x399   :  { %v420_v42 = vmul.f32 %v418_v41, %v414_v10 }
 0x39b   :  { %421 = vst.msk [vmem:[#allocation9] sm:$0xff] %vm37_vm0, %v420_v42 }
 0x39c   :  { %500 = shalt.err (!%p497_p12)
}
 0x39d   :  { %s501_s5 = scalar_lea.hbm %s714_s3, 128 }
 0x39e   :  { %p502_p13 = scmp.ne.s32.totalorder %s714_s3, %s501_s5  ;;  %p505_p0 = scmp.lt.u32.totalorder %s501_s5, %s714_s3 }
 0x3a0   :  { %p507_p1 = pnand %p505_p0, %p502_p13 }
 0x3a2   :  { %510 = shalt.err (!%p507_p1)
}
 0x3a3   :  { %431 = dma.vmem_to_hbm [thread:$0]  %s429_s28, 128, %s714_s3, [#allocation8]  }
 0x3a4   :  { %513 = dma.done.wait [#allocation8], 128  }
 0x3a5   :  { %514 = vsyncadd [#allocation8], 4294967168 }
 0x3a6   :  { %435 = vsyncpa [#allocation7], 1 }
 0x3a7   :  { %436 = vsyncpa [#allocation8], 1 }

</bundles_post_ra>
